<compile_context>
chip_gen: v7x
topology: tpu7x:2x2x1
jax: 0.10.0
libtpu: 0.0.40
codegen_flags: <defaults>
</compile_context>

<pallas_src>
import functools

import jax
import jax.numpy as jnp
from jax import lax
from jax.experimental import pallas as pl
from jax.experimental.pallas import tpu as pltpu


def _round_up(x, m):
    return ((x + m - 1) // m) * m


def _rnn_classify_kernel(ids_ref, slab_a_ref, slab_b_ref, out_ref):
    """One-hot embedding gather + tanh-RNN recurrence + linear classifier.

    ids_ref    : (L*Bp, 1) int32  time-major token ids (row = t*Bp + b)
    slab_a_ref : (Vp+D, D) f32    rows [0, Vp):  proj_table = emb @ W_ih^T + b
                                  rows [Vp, Vp+D): W_hh^T
    slab_b_ref : (D+8, Cp) f32    rows [0, D): W_cls^T (cols zero-padded to Cp)
                                  row D: b_cls ; remaining rows zero
    out_ref    : (Bp, Cp)  f32    logits (single lane-dense store)
    """
    Bp, _ = out_ref.shape
    LBp = ids_ref.shape[0]
    L = LBp // Bp
    D = slab_a_ref.shape[1]
    Vp = slab_a_ref.shape[0] - D

    ptab = slab_a_ref[:Vp, :]                    # (Vp, D) projected emb table
    whh = slab_a_ref[Vp:Vp + D, :]               # (D, D)  W_hh^T

    # Embedding gather as a one-hot matmul (exact: one 1.0 per row, zeros
    # elsewhere). Padded batch rows carry id 0; their results are discarded
    # by the host slice (note: would only matter if table row 0 were non-finite).
    ids = ids_ref[...]                                            # (L*Bp, 1)
    lane = lax.broadcasted_iota(jnp.int32, (LBp, Vp), 1)
    onehot = (lane == ids).astype(jnp.float32)                    # (L*Bp, Vp)
    xp = jnp.dot(onehot, ptab, preferred_element_type=jnp.float32)  # in vregs

    # t = 0: h_0 == 0, so the W_hh matmul contributes nothing.
    h = jnp.tanh(xp[:Bp, :])
    # L is small and static: fully unroll; static slices land on (8,128) tiles.
    for t in range(1, L):
        h = jnp.tanh(xp[t * Bp:(t + 1) * Bp, :]
                     + jnp.dot(h, whh, preferred_element_type=jnp.float32))

    wcls = slab_b_ref[:D, :]                     # (D, Cp)
    bcls = slab_b_ref[D:D + 1, :]                # (1, Cp)
    out_ref[...] = (jnp.dot(h, wcls, preferred_element_type=jnp.float32)
                    + bcls)


def prepare_params(params):
    """One-time weight preprocessing (kept out of the per-call jit path)."""
    emb = params["embedding"].astype(jnp.float32)        # (V, D)
    w_ih = params["w_ih"].astype(jnp.float32)            # (D, D) torch (out, in)
    w_hh = params["w_hh"].astype(jnp.float32)            # (D, D)
    b = (params["b_ih"] + params["b_hh"]).astype(jnp.float32)    # (D,)
    w_cls = params["w_cls"].astype(jnp.float32)          # (C, D)
    b_cls = params["b_cls"].astype(jnp.float32)          # (C,)

    V, D = emb.shape
    C = w_cls.shape[0]
    Vp = _round_up(V, 8)
    # Keep Cp at exactly one 128-lane tile for C <= 128.
    # TODO(synk): if C ever exceeds 128, split the classifier matmul over
    # 128-wide column tiles instead of widening the output store.
    Cp = _round_up(C, 128)

    # Fold the input projection + both biases into the embedding table.
    proj_table = emb @ w_ih.T + b                        # (V, D)

    slab_a = jnp.zeros((Vp + D, D), jnp.float32)
    slab_a = slab_a.at[:V, :].set(proj_table)
    slab_a = slab_a.at[Vp:, :].set(w_hh.T)

    slab_b = jnp.zeros((D + 8, Cp), jnp.float32)
    slab_b = slab_b.at[:D, :C].set(w_cls.T)
    slab_b = slab_b.at[D, :C].set(b_cls)

    return jax.device_put(slab_a), jax.device_put(slab_b), int(C)


@functools.partial(jax.jit, static_argnames=("num_classes",))
def torch_model_forward(x_ids, slab_a, slab_b, *, num_classes):
    """x_ids: (B, L) int32 token ids -> logits (B, num_classes) float32."""
    B, L = x_ids.shape
    Cp = slab_b.shape[1]
    Bp = _round_up(B, 8)                  # pad batch to the sublane width

    # Tiny id reshuffle (tens of bytes): time-major, batch padded with id 0.
    ids_tm = jnp.transpose(x_ids).astype(jnp.int32)      # (L, B)
    ids_tm = jnp.pad(ids_tm, ((0, 0), (0, Bp - B)))      # (L, Bp)
    ids_tm = ids_tm.reshape(L * Bp, 1)

    out_padded = pl.pallas_call(
        _rnn_classify_kernel,
        out_shape=jax.ShapeDtypeStruct((Bp, Cp), jnp.float32),
        in_specs=[
            pl.BlockSpec(memory_space=pltpu.MemorySpace.VMEM),  # ids
            pl.BlockSpec(memory_space=pltpu.MemorySpace.VMEM),  # slab_a
            pl.BlockSpec(memory_space=pltpu.MemorySpace.VMEM),  # slab_b
        ],
        out_specs=pl.BlockSpec(memory_space=pltpu.MemorySpace.VMEM),
    )(ids_tm, slab_a, slab_b)
    # TODO(synk): for large batch on v7x, add a grid over Bp//8 batch tiles
    # with dimension_semantics=("parallel",) so both TensorCores are used;
    # at B=2 this is a no-op (review).

    return out_padded[:B, :num_classes]


def init_params(key, vocab_size, vector_dim, sentence_length):
    D = vector_dim
    C = sentence_length + 1
    ks = jax.random.split(key, 7)
    scale = 1.0 / jnp.sqrt(D)
    return {
        "embedding": jax.random.normal(ks[0], (vocab_size, D), jnp.float32),
        "w_ih": jax.random.uniform(ks[1], (D, D), jnp.float32, -scale, scale),
        "w_hh": jax.random.uniform(ks[2], (D, D), jnp.float32, -scale, scale),
        "b_ih": jax.random.uniform(ks[3], (D,), jnp.float32, -scale, scale),
        "b_hh": jax.random.uniform(ks[4], (D,), jnp.float32, -scale, scale),
        "w_cls": jax.random.uniform(ks[5], (C, D), jnp.float32, -scale, scale),
        "b_cls": jax.random.uniform(ks[6], (C,), jnp.float32, -scale, scale),
    }


def _reference_forward(x_ids, params):
    """Pure-JAX reference of the same forward pass (sanity check)."""
    emb = jnp.take(params["embedding"], x_ids, axis=0)   # (B, L, D)
    B, L, D = emb.shape
    h = jnp.zeros((B, D), jnp.float32)
    for t in range(L):
        h = jnp.tanh(emb[:, t, :] @ params["w_ih"].T + params["b_ih"]
                     + h @ params["w_hh"].T + params["b_hh"])
    return h @ params["w_cls"].T + params["b_cls"]


if __name__ == "__main__":
    # Small shapes consistent with the module: vocab=30, vector_dim=32,
    # sentence_length=8, batch=2.
    VOCAB = 30
    VECTOR_DIM = 32
    SENT_LEN = 8
    BATCH = 2

    key = jax.random.PRNGKey(0)
    pkey, xkey = jax.random.split(key)
    params = init_params(pkey, VOCAB, VECTOR_DIM, SENT_LEN)
    slab_a, slab_b, num_classes = prepare_params(params)

    x = jax.random.randint(xkey, (BATCH, SENT_LEN), 0, VOCAB, dtype=jnp.int32)

    y_pred = torch_model_forward(x, slab_a, slab_b, num_classes=num_classes)
    y_pred = jax.block_until_ready(y_pred)

    ref = _reference_forward(x, params)
    assert y_pred.shape == (BATCH, SENT_LEN + 1)
    assert jnp.allclose(y_pred, ref, atol=1e-4, rtol=1e-4)

    # TODO(synk): cross_entropy loss branch (y is not None) not implemented;
    # only the inference path (return y_pred) is reproduced.
    print("KERNEL_OK")
</pallas_src>

<mosaic_0001>
module attributes {stable_mosaic.version = 11 : i64} {
  func.func @_rnn_classify_kernel(%arg0: memref<64x1xi32, #tpu.memory_space<vmem>>, %arg1: memref<64x32xf32, #tpu.memory_space<vmem>>, %arg2: memref<40x128xf32, #tpu.memory_space<vmem>>, %arg3: memref<8x128xf32, #tpu.memory_space<vmem>>) attributes {dimension_semantics = [], scalar_prefetch = 0 : i64, scratch_operands = 0 : i64, tpu.core_type = #tpu.core_type<tc>} {
    %c0 = arith.constant 0 : index
    %c0_0 = arith.constant 0 : index
    %0 = vector.load %arg1[%c0, %c0_0] : memref<64x32xf32, #tpu.memory_space<vmem>>, vector<32x32xf32>
    %c32 = arith.constant 32 : index
    %c0_1 = arith.constant 0 : index
    %1 = vector.load %arg1[%c32, %c0_1] : memref<64x32xf32, #tpu.memory_space<vmem>>, vector<32x32xf32>
    %c0_2 = arith.constant 0 : index
    %c0_3 = arith.constant 0 : index
    %2 = vector.load %arg0[%c0_2, %c0_3] : memref<64x1xi32, #tpu.memory_space<vmem>>, vector<64x1xi32>
    %3 = tpu.iota {dimensions = array<i32: 1>} : vector<64x32xi32>
    %4 = vector.broadcast %2 : vector<64x1xi32> to vector<64x32xi32>
    %5 = arith.cmpi eq, %3, %4 : vector<64x32xi32>
    %6 = arith.extui %5 : vector<64x32xi1> to vector<64x32xi32>
    %7 = arith.sitofp %6 : vector<64x32xi32> to vector<64x32xf32>
    %cst = arith.constant dense<0.000000e+00> : vector<64x32xf32>
    %8 = tpu.matmul %7, %0, %cst {dimension_numbers = #tpu.dot_dimension_numbers<[1], [0], [0], [1], [0, 0, 1, 1], [], []>} : vector<64x32xf32>, vector<32x32xf32>, vector<64x32xf32> -> vector<64x32xf32>
    %9 = vector.extract_strided_slice %8 {offsets = [0, 0], sizes = [8, 32], strides = [1, 1]} : vector<64x32xf32> to vector<8x32xf32>
    %10 = math.tanh %9 : vector<8x32xf32>
    %11 = vector.extract_strided_slice %8 {offsets = [8, 0], sizes = [8, 32], strides = [1, 1]} : vector<64x32xf32> to vector<8x32xf32>
    %cst_4 = arith.constant dense<0.000000e+00> : vector<8x32xf32>
    %12 = tpu.matmul %10, %1, %cst_4 {dimension_numbers = #tpu.dot_dimension_numbers<[1], [0], [0], [1], [0, 0, 1, 1], [], []>} : vector<8x32xf32>, vector<32x32xf32>, vector<8x32xf32> -> vector<8x32xf32>
    %13 = arith.addf %11, %12 : vector<8x32xf32>
    %14 = math.tanh %13 : vector<8x32xf32>
    %15 = vector.extract_strided_slice %8 {offsets = [16, 0], sizes = [8, 32], strides = [1, 1]} : vector<64x32xf32> to vector<8x32xf32>
    %cst_5 = arith.constant dense<0.000000e+00> : vector<8x32xf32>
    %16 = tpu.matmul %14, %1, %cst_5 {dimension_numbers = #tpu.dot_dimension_numbers<[1], [0], [0], [1], [0, 0, 1, 1], [], []>} : vector<8x32xf32>, vector<32x32xf32>, vector<8x32xf32> -> vector<8x32xf32>
    %17 = arith.addf %15, %16 : vector<8x32xf32>
    %18 = math.tanh %17 : vector<8x32xf32>
    %19 = vector.extract_strided_slice %8 {offsets = [24, 0], sizes = [8, 32], strides = [1, 1]} : vector<64x32xf32> to vector<8x32xf32>
    %cst_6 = arith.constant dense<0.000000e+00> : vector<8x32xf32>
    %20 = tpu.matmul %18, %1, %cst_6 {dimension_numbers = #tpu.dot_dimension_numbers<[1], [0], [0], [1], [0, 0, 1, 1], [], []>} : vector<8x32xf32>, vector<32x32xf32>, vector<8x32xf32> -> vector<8x32xf32>
    %21 = arith.addf %19, %20 : vector<8x32xf32>
    %22 = math.tanh %21 : vector<8x32xf32>
    %23 = vector.extract_strided_slice %8 {offsets = [32, 0], sizes = [8, 32], strides = [1, 1]} : vector<64x32xf32> to vector<8x32xf32>
    %cst_7 = arith.constant dense<0.000000e+00> : vector<8x32xf32>
    %24 = tpu.matmul %22, %1, %cst_7 {dimension_numbers = #tpu.dot_dimension_numbers<[1], [0], [0], [1], [0, 0, 1, 1], [], []>} : vector<8x32xf32>, vector<32x32xf32>, vector<8x32xf32> -> vector<8x32xf32>
    %25 = arith.addf %23, %24 : vector<8x32xf32>
    %26 = math.tanh %25 : vector<8x32xf32>
    %27 = vector.extract_strided_slice %8 {offsets = [40, 0], sizes = [8, 32], strides = [1, 1]} : vector<64x32xf32> to vector<8x32xf32>
    %cst_8 = arith.constant dense<0.000000e+00> : vector<8x32xf32>
    %28 = tpu.matmul %26, %1, %cst_8 {dimension_numbers = #tpu.dot_dimension_numbers<[1], [0], [0], [1], [0, 0, 1, 1], [], []>} : vector<8x32xf32>, vector<32x32xf32>, vector<8x32xf32> -> vector<8x32xf32>
    %29 = arith.addf %27, %28 : vector<8x32xf32>
    %30 = math.tanh %29 : vector<8x32xf32>
    %31 = vector.extract_strided_slice %8 {offsets = [48, 0], sizes = [8, 32], strides = [1, 1]} : vector<64x32xf32> to vector<8x32xf32>
    %cst_9 = arith.constant dense<0.000000e+00> : vector<8x32xf32>
    %32 = tpu.matmul %30, %1, %cst_9 {dimension_numbers = #tpu.dot_dimension_numbers<[1], [0], [0], [1], [0, 0, 1, 1], [], []>} : vector<8x32xf32>, vector<32x32xf32>, vector<8x32xf32> -> vector<8x32xf32>
    %33 = arith.addf %31, %32 : vector<8x32xf32>
    %34 = math.tanh %33 : vector<8x32xf32>
    %35 = vector.extract_strided_slice %8 {offsets = [56, 0], sizes = [8, 32], strides = [1, 1]} : vector<64x32xf32> to vector<8x32xf32>
    %cst_10 = arith.constant dense<0.000000e+00> : vector<8x32xf32>
    %36 = tpu.matmul %34, %1, %cst_10 {dimension_numbers = #tpu.dot_dimension_numbers<[1], [0], [0], [1], [0, 0, 1, 1], [], []>} : vector<8x32xf32>, vector<32x32xf32>, vector<8x32xf32> -> vector<8x32xf32>
    %37 = arith.addf %35, %36 : vector<8x32xf32>
    %38 = math.tanh %37 : vector<8x32xf32>
    %c0_11 = arith.constant 0 : index
    %c0_12 = arith.constant 0 : index
    %39 = vector.load %arg2[%c0_11, %c0_12] : memref<40x128xf32, #tpu.memory_space<vmem>>, vector<32x128xf32>
    %c32_13 = arith.constant 32 : index
    %c0_14 = arith.constant 0 : index
    %40 = vector.load %arg2[%c32_13, %c0_14] : memref<40x128xf32, #tpu.memory_space<vmem>>, vector<1x128xf32>
    %cst_15 = arith.constant dense<0.000000e+00> : vector<8x128xf32>
    %41 = tpu.matmul %38, %39, %cst_15 {dimension_numbers = #tpu.dot_dimension_numbers<[1], [0], [0], [1], [0, 0, 1, 1], [], []>} : vector<8x32xf32>, vector<32x128xf32>, vector<8x128xf32> -> vector<8x128xf32>
    %42 = vector.broadcast %40 : vector<1x128xf32> to vector<8x128xf32>
    %43 = arith.addf %41, %42 : vector<8x128xf32>
    %c0_16 = arith.constant 0 : index
    %c0_17 = arith.constant 0 : index
    %44 = vector.load %arg3[%c0_16, %c0_17] : memref<8x128xf32, #tpu.memory_space<vmem>>, vector<8x128xf32>
    tpu.vector_store %arg3[%c0_16, %c0_17], %43 {strides = array<i32>} : memref<8x128xf32, #tpu.memory_space<vmem>>, vector<8x128xf32>,
    return
  }
}

</mosaic_0001>

<bundles_post_ra>
// kernel: torch_model_forward.1
= control target key start
LH: loop header
LB: loop body
LE: loop exit
PB: predicated region body
PF: predicated region fallthrough
CT: control target
= control target key end

     0   :  { %v1086_v0 = vmov 0   ;;  %v30_v14 = vlaneseq  ;;  %vm80_vm0 = vcmask 261120   ;;  %v1087_v18 = vmov 0.0   ;;  %s1260_s0 = inlined_call_operand.vmem [shape: s32[64,1], index: 0, kind: input, shape index: {}]   ;;  %s1261_s1 = inlined_call_operand.vmem [shape: f32[64,32], index: 1, kind: input, shape index: {}]   ;;  %s1262_s2 = inlined_call_operand.vmem [shape: f32[40,128], index: 2, kind: input, shape index: {}]   ;;  %s1263_s3 = inlined_call_operand.vmem [shape: f32[8,128], index: 3, kind: output, shape index: {}]  }
   0x1   :  { %1068 = vset.pattern.permute.xlu0 %v1086_v0  ;;  %v22_v1 = vld [vmem:[%s1260_s0] sm:$0xff]  ;;  %1069 = vset.pattern.permute.xlu1 %v1086_v0  ;;  %v24_v2 = vld [vmem:[%s1260_s0 + $0x10] sm:$0xff]  ;;  %v23_v3 = vld [vmem:[%s1260_s0 + $0x8] sm:$0xff]  ;;  %v1088_v34 = vmov 0.0|0.0   ;;  %vm1089_vm8 = vmmov 0  }
   0x2   :  { %33 = vperm.xlu0 %1068, %v22_v1   ;;  %39 = vperm.xlu1 %1069, %v24_v2   ;;  %v25_v4 = vld [vmem:[%s1260_s0 + $0x18] sm:$0xff]  ;;  %v14_v5 = vld [vmem:[%s1261_s1] sm:$0xff]  ;;  %v15_v6 = vld [vmem:[%s1261_s1 + $0x8] sm:$0xff]  ;;  %v1143_v15 = vand.u32 127, %v30_v14 }
   0x3   :  { %v1008_v7 = vpack.c.bf16 %v15_v6, %v14_v5  ;;  %v16_v8 = vld [vmem:[%s1261_s1 + $0x10] sm:$0xff]  ;;  %v17_v9 = vld [vmem:[%s1261_s1 + $0x18] sm:$0xff]  ;;  %v26_v11 = vld [vmem:[%s1260_s0 + $0x20] sm:$0xff]  ;;  %1016 = vmatprep.subr.bf16.mxu1 %v1088_v34  ;;  %928 = vmatprep.mubr.msk.f32.mxu1 %vm1089_vm8, %v1087_v18 }
   0x4   :  { %v1012_v10 = vpack.c.bf16 %v17_v9, %v16_v8  ;;  %v27_v12 = vld [vmem:[%s1260_s0 + $0x28] sm:$0xff]  ;;  %v28_v13 = vld [vmem:[%s1260_s0 + $0x30] sm:$0xff]  ;;  %v18_v31 = vld [vmem:[%s1261_s1 + $0x20] sm:$0xff] }
   0x5   :  { %1009 = vmatprep.subr.bf16.mxu0 %v1008_v7  ;;  %v19_v32 = vld [vmem:[%s1261_s1 + $0x28] sm:$0xff]  ;;  %v20_v33 = vld [vmem:[%s1261_s1 + $0x30] sm:$0xff]  ;;  %v21_v36 = vld [vmem:[%s1261_s1 + $0x38] sm:$0xff] }
   0x6   :  { %36 = vperm.xlu0 %1068, %v23_v3   ;;  %42 = vperm.xlu1 %1069, %v25_v4   ;;  %v1176_v35 = vpack.c.bf16 %v19_v32, %v18_v31  ;;  %v1185_v37 = vpack.c.bf16 %v21_v36, %v20_v33  ;;  %v29_v38 = vld [vmem:[%s1260_s0 + $0x38] sm:$0xff] }
   0x7   :  { %1011 = vmatpush3.bf16.msra.mxu0 %v1008_v7  ;;  %v739_v14 = vld [vmem:[%s1262_s2 + $0x18] sm:$0xff] }
   0x8   :  { %1013 = vmatprep.subr.bf16.mxu0 %v1012_v10  ;;  %1018 = vmatpush3.bf16.msra.mxu1 %v1176_v35 }
   0x9   :  { %1019 = vmatprep.subr.bf16.mxu1 %v1088_v34 }
   0xa   :  { %45 = vperm.xlu0 %1068, %v26_v11   ;;  %48 = vperm.xlu1 %1069, %v27_v12   ;;  %v737_v11 = vld [vmem:[%s1262_s2 + $0x8] sm:$0xff]  ;;  %v738_v12 = vld [vmem:[%s1262_s2 + $0x10] sm:$0xff] }
   0xb   :  { %1015 = vmatpush3.bf16.msra.mxu0 %v1012_v10  ;;  %v736_v10 = vld [vmem:[%s1262_s2] sm:$0xff] }
   0xc   :  { %1028 = vmatprep.subr.bf16.mxu0 %v1088_v34  ;;  %1021 = vmatpush3.bf16.msra.mxu1 %v1185_v37 }
   0xd   :  { %1022 = vmatprep.subr.bf16.mxu1 %v1088_v34 }
   0xe   :  { %51 = vperm.xlu0 %1068, %v28_v13   ;;  %54 = vperm.xlu1 %1069, %v29_v38   ;;  %v1059_v13 = vpack.c.bf16 %v737_v11, %v736_v10 }
  0x81   :  { %v34_v16 = vpop.permute.xlu0 %33  ;;  %v40_v17 = vpop.permute.xlu1 %39 }
  0x82   :  { %vm56_vm1 = vcmp.eq.s32.totalorder %v1143_v15, %v34_v16  ;;  %vm58_vm2 = vcmp.eq.s32.totalorder %v1143_v15, %v40_v17 }
  0x83   :  { %v823_v19 = vsel %vm56_vm1, 1.0, %v1087_v18  ;;  %v825_v22 = vsel %vm58_vm2, 1.0, %v1087_v18 }
  0x84   :  { %908 = vmatprep.mubr.msk.f32.mxu0 %vm80_vm0, %v823_v19 }
  0x85   :  { %v37_v20 = vpop.permute.xlu0 %36  ;;  %v43_v21 = vpop.permute.xlu1 %42 }
  0x86   :  { %vm57_vm3 = vcmp.eq.s32.totalorder %v1143_v15, %v37_v20  ;;  %vm59_vm4 = vcmp.eq.s32.totalorder %v1143_v15, %v43_v21  ;;  %v846_v20 = vld [vmem:[%s1262_s2 + $0x20] ss:$0 sm:$0xff] }
  0x87   :  { %v824_v23 = vsel %vm57_vm3, 1.0, %v1087_v18  ;;  %v826_v24 = vsel %vm59_vm4, 1.0, %v1087_v18 }
  0x88   :  { %909 = vmatmul.mubr.msk.f32.vlgmr.msra.gmra.mrb[0].mxu0 %vm80_vm0, %v824_v23 }
  0x89   :  { %v46_v25 = vpop.permute.xlu0 %45  ;;  %911 = vmatprep.mubr.msk.f32.mxu0 %vm80_vm0, %v825_v22  ;;  %v49_v26 = vpop.permute.xlu1 %48  ;;  %1030 = vmatpush3.bf16.msra.mxu0 %v1176_v35 }
  0x8a   :  { %vm60_vm5 = vcmp.eq.s32.totalorder %v1143_v15, %v46_v25  ;;  %vm61_vm6 = vcmp.eq.s32.totalorder %v1143_v15, %v49_v26  ;;  %1031 = vmatprep.subr.bf16.mxu0 %v1088_v34 }
  0x8b   :  { %v827_v27 = vsel %vm60_vm5, 1.0, %v1087_v18  ;;  %v828_v28 = vsel %vm61_vm6, 1.0, %v1087_v18 }
  0x8c   :  { %912 = vmatmul.mubr.msk.f32.gmra.mrb[2].mxu0 %vm80_vm0, %v826_v24 }
  0x8d   :  { %914 = vmatprep.mubr.msk.f32.mxu0 %vm80_vm0, %v827_v27  ;;  %v52_v29 = vpop.permute.xlu0 %51  ;;  %1033 = vmatpush3.bf16.msra.mxu0 %v1185_v37  ;;  %v55_v42 = vpop.permute.xlu1 %54 }
  0x8e   :  { %vm62_vm7 = vcmp.eq.s32.totalorder %v1143_v15, %v52_v29  ;;  %1040 = vmatprep.subr.bf16.mxu0 %v1088_v34  ;;  %vm63_vm9 = vcmp.eq.s32.totalorder %v1143_v15, %v55_v42  ;;  %v1062_v15 = vpack.c.bf16 %v739_v14, %v738_v12 }
  0x8f   :  { %v829_v30 = vsel %vm62_vm7, 1.0, %v1087_v18  ;;  %v830_v43 = vsel %vm63_vm9, 1.0, %v1087_v18 }
  0x90   :  { %915 = vmatmul.mubr.msk.f32.gmra.mrb[4].mxu0 %vm80_vm0, %v828_v28 }
  0x91   :  { %917 = vmatprep.mubr.msk.f32.mxu0 %vm80_vm0, %v829_v30 }
  0x94   :  { %918 = vmatmul.mubr.msk.f32.gmra.mrb[6].mxu0 %vm80_vm0, %v830_v43 }
  0x95   :  { %950 = vmatprep.mubr.msk.f32.mxu0 %vm1089_vm8, %v1087_v18 }
 0x15b   :  { %v910_v39 = vpop.f32.mrb[0].mxu0 }
 0x15c   :  { %v171_v40 = vpop.f32.mrb[1].mxu0 }
 0x15d   :  { %1070 = vtanh.f32 %v171_v40 }
 0x15f   :  { %v913_v44 = vpop.f32.mrb[2].mxu0 }
 0x160   :  { %v181_v45 = vpop.f32.mrb[3].mxu0 }
 0x163   :  { %v916_v46 = vpop.f32.mrb[4].mxu0 }
 0x164   :  { %v191_v47 = vpop.f32.mrb[5].mxu0 }
 0x167   :  { %v1071_v41 = vpop.eup %1070  ;;  %v919_v52 = vpop.f32.mrb[6].mxu0 }
 0x168   :  { %929 = vmatmul.mubr.msk.f32.vlgmr.msra.gmra.mrb[0].mxu1 %vm80_vm0, %v1071_v41  ;;  %v201_v53 = vpop.f32.mrb[7].mxu0 }
 0x169   :  { %1024 = vmatpush3.bf16.msra.mxu1 %v1176_v35  ;;  %939 = vmatprep.mubr.msk.f32.mxu1 %vm1089_vm8, %v1087_v18 }
 0x16a   :  { %1025 = vmatprep.subr.bf16.mxu1 %v1088_v34 }
 0x16d   :  { %1027 = vmatpush3.bf16.msra.mxu1 %v1185_v37 }
 0x16e   :  { %1034 = vmatprep.subr.bf16.mxu1 %v1088_v34 }
 0x23b   :  { %v280_v48 = vpop.f32.mrb[0].mxu1 }
 0x23c   :  { %v284_v49 = vadd.f32 %v910_v39, %v280_v48  ;;  %v930_v50 = vpop.f32.mrb[1].mxu1 }
 0x23e   :  { %1072 = vtanh.f32 %v284_v49 }
 0x248   :  { %v1073_v51 = vpop.eup %1072 }
 0x249   :  { %940 = vmatmul.mubr.msk.f32.vlgmr.msra.gmra.mrb[2].mxu1 %vm80_vm0, %v1073_v51 }
 0x24a   :  { %1036 = vmatpush3.bf16.msra.mxu1 %v1176_v35  ;;  %961 = vmatprep.mubr.msk.f32.mxu1 %vm1089_vm8, %v1087_v18 }
 0x24b   :  { %1037 = vmatprep.subr.bf16.mxu1 %v1088_v34 }
 0x24e   :  { %1039 = vmatpush3.bf16.msra.mxu1 %v1185_v37 }
 0x24f   :  { %1046 = vmatprep.subr.bf16.mxu1 %v1088_v34 }
 0x31c   :  { %v355_v54 = vpop.f32.mrb[2].mxu1 }
 0x31d   :  { %v359_v55 = vadd.f32 %v355_v54, %v181_v45  ;;  %v941_v56 = vpop.f32.mrb[3].mxu1 }
 0x31f   :  { %1074 = vtanh.f32 %v359_v55 }
 0x329   :  { %v1075_v57 = vpop.eup %1074 }
 0x32a   :  { %951 = vmatmul.mubr.msk.f32.vlgmr.msra.gmra.mrb[8].mxu0 %vm80_vm0, %v1075_v57 }
 0x32b   :  { %1042 = vmatpush3.bf16.msra.mxu0 %v1176_v35  ;;  %972 = vmatprep.mubr.msk.f32.mxu0 %vm1089_vm8, %v1087_v18 }
 0x32c   :  { %1043 = vmatprep.subr.bf16.mxu0 %v1088_v34 }
 0x32f   :  { %1045 = vmatpush3.bf16.msra.mxu0 %v1185_v37 }
 0x330   :  { %1052 = vmatprep.subr.bf16.mxu0 %v1088_v34 }
 0x3fd   :  { %v430_v58 = vpop.f32.mrb[8].mxu0 }
 0x3fe   :  { %v434_v59 = vadd.f32 %v913_v44, %v430_v58  ;;  %v952_v60 = vpop.f32.mrb[9].mxu0 }
 0x400   :  { %1076 = vtanh.f32 %v434_v59 }
 0x40a   :  { %v1077_v61 = vpop.eup %1076 }
 0x40b   :  { %962 = vmatmul.mubr.msk.f32.vlgmr.msra.gmra.mrb[4].mxu1 %vm80_vm0, %v1077_v61 }
 0x40c   :  { %1048 = vmatpush3.bf16.msra.mxu1 %v1176_v35  ;;  %983 = vmatprep.mubr.msk.f32.mxu1 %vm1089_vm8, %v1087_v18 }
 0x40d   :  { %1049 = vmatprep.subr.bf16.mxu1 %v1088_v34 }
 0x410   :  { %1051 = vmatpush3.bf16.msra.mxu1 %v1185_v37 }
 0x411   :  { %1058 = vmatprep.subr.bf16.mxu1 %v1088_v34 }
 0x4de   :  { %v505_v62 = vpop.f32.mrb[4].mxu1 }
 0x4df   :  { %v509_v63 = vadd.f32 %v505_v62, %v191_v47  ;;  %v963_v0 = vpop.f32.mrb[5].mxu1 }
 0x4e1   :  { %1078 = vtanh.f32 %v509_v63 }
 0x4eb   :  { %v1079_v1 = vpop.eup %1078 }
 0x4ec   :  { %973 = vmatmul.mubr.msk.f32.vlgmr.msra.gmra.mrb[10].mxu0 %vm80_vm0, %v1079_v1 }
 0x4ed   :  { %1054 = vmatpush3.bf16.msra.mxu0 %v1176_v35  ;;  %994 = vmatprep.mubr.msk.f32.mxu0 %vm1089_vm8, %v1087_v18 }
 0x4ee   :  { %1055 = vmatprep.subr.bf16.mxu0 %v1088_v34 }
 0x4f1   :  { %1057 = vmatpush3.bf16.msra.mxu0 %v1185_v37 }
 0x5bf   :  { %v580_v2 = vpop.f32.mrb[10].mxu0 }
 0x5c0   :  { %v584_v3 = vadd.f32 %v916_v46, %v580_v2  ;;  %v974_v4 = vpop.f32.mrb[11].mxu0 }
 0x5c2   :  { %1080 = vtanh.f32 %v584_v3 }
 0x5cc   :  { %v1081_v5 = vpop.eup %1080 }
 0x5cd   :  { %984 = vmatmul.mubr.msk.f32.vlgmr.msra.gmra.mrb[6].mxu1 %vm80_vm0, %v1081_v5 }
 0x5ce   :  { %1005 = vmatprep.mubr.msk.f32.mxu1 %vm1089_vm8, %v1087_v18  ;;  %1060 = vmatpush3.bf16.msra.mxu1 %v1059_v13 }
 0x5cf   :  { %1061 = vmatprep.subr.bf16.mxu1 %v1088_v34 }
 0x5d2   :  { %1063 = vmatpush3.bf16.msra.mxu1 %v1062_v15 }
 0x6a0   :  { %v655_v6 = vpop.f32.mrb[6].mxu1 }
 0x6a1   :  { %v659_v7 = vadd.f32 %v655_v6, %v201_v53  ;;  %v985_v8 = vpop.f32.mrb[7].mxu1 }
 0x6a3   :  { %1082 = vtanh.f32 %v659_v7 }
 0x6ad   :  { %v1083_v9 = vpop.eup %1082 }
 0x6ae   :  { %995 = vmatmul.mubr.msk.f32.vlgmr.msra.gmra.mrb[12].mxu0 %vm80_vm0, %v1083_v9 }
 0x781   :  { %v730_v16 = vpop.f32.mrb[12].mxu0 }
 0x782   :  { %v734_v17 = vadd.f32 %v919_v52, %v730_v16  ;;  %v996_v18 = vpop.f32.mrb[13].mxu0 }
 0x784   :  { %1084 = vtanh.f32 %v734_v17 }
 0x78e   :  { %v1085_v19 = vpop.eup %1084 }
 0x78f   :  { %1006 = vmatmul.mubr.msk.f32.vlgmr.msra.gmra.mrb[8].mxu1 %vm80_vm0, %v1085_v19 }
 0x862   :  { %v814_v21 = vpop.f32.mrb[8].mxu1 }
 0x863   :  { %v815_v22 = vadd.f32 %v846_v20, %v814_v21  ;;  %v1007_v23 = vpop.f32.mrb[9].mxu1 }
 0x865   :  { %818 = vst [vmem:[%s1263_s3] sm:$0xff] %v815_v22 }

</bundles_post_ra>
